<compile_context>
chip_gen: v5e
topology: v5e:2x2
jax: 0.10.0
libtpu: 0.0.40
codegen_flags: <defaults>
</compile_context>

<pallas_src>
import functools

import jax
import jax.numpy as jnp
from jax.experimental import pallas as pl
from jax.experimental.pallas import tpu as pltpu


def _round_up(a, b):
    return (a + b - 1) // b * b


def _conv_tile(x_main_ref, x_halo_ref, w_ref, *, kernel_size, dilation, tile_l, halo):
    """Dilated Conv1d for one (batch, L) tile as a single fused MXU matmul.

    x_main_ref: (1, C_in, TILE_L)    output-aligned x window
    x_halo_ref: (1, C_in, HALO_PAD)  next-tile columns covering the dilation halo
    w_ref:      (C_out, K*C_in)      flattened weight (rows match xstack order)
    returns     (C_out, TILE_L) float32
    """
    if halo > 0:
        xwin = jnp.concatenate([x_main_ref[0], x_halo_ref[0]], axis=-1)
    else:
        xwin = x_main_ref[0]
    xwin = xwin.astype(jnp.float32)
    if kernel_size > 1:
        # Stack the K dilation-shifted slices along the contraction (sublane) axis so
        # the whole conv is one (C_out, K*C_in) @ (K*C_in, TILE_L) matmul.
        xstack = jnp.concatenate(
            [xwin[:, k * dilation: k * dilation + tile_l] for k in range(kernel_size)],
            axis=0)
    else:
        xstack = xwin[:, :tile_l]
    return jnp.dot(w_ref[...].astype(jnp.float32), xstack,
                   preferred_element_type=jnp.float32)


def _stats_kernel(x_main_ref, x_halo_ref, w_ref, sum_ref, sumsq_ref, *,
                  kernel_size, dilation, tile_l, halo, l_out, needs_mask):
    """Pass 1: per-(batch, L-tile) partial sum / sum-of-squares of the conv output."""
    acc = _conv_tile(x_main_ref, x_halo_ref, w_ref, kernel_size=kernel_size,
                     dilation=dilation, tile_l=tile_l, halo=halo)

    def write(a):
        sum_ref[0, 0] = jnp.sum(a, axis=1, keepdims=True)
        sumsq_ref[0, 0] = jnp.sum(a * a, axis=1, keepdims=True)

    if needs_mask:
        j = pl.program_id(1)
        last = pl.num_programs(1) - 1

        @pl.when(j == last)            # mask the ragged L tail only on the last tile
        def _():
            lane = jax.lax.broadcasted_iota(jnp.int32, acc.shape, 1)
            valid = (j * tile_l + lane) < l_out
            write(jnp.where(valid, acc, 0.0))

        @pl.when(j != last)            # interior tiles: plain reductions, no iota/select
        def _():
            write(acc)
    else:
        write(acc)


def _norm_kernel(x_main_ref, x_halo_ref, w_ref, scale_ref, shift_ref, o_ref, *,
                 kernel_size, dilation, tile_l, halo, slope):
    """Pass 2: recompute conv tile -> BN affine (scale/shift) -> LeakyReLU -> store."""
    acc = _conv_tile(x_main_ref, x_halo_ref, w_ref, kernel_size=kernel_size,
                     dilation=dilation, tile_l=tile_l, halo=halo)
    y = acc * scale_ref[...] + shift_ref[...]
    o_ref[0] = jnp.maximum(y, slope * y).astype(o_ref.dtype)


def dilated_conv_forward(x_ncl, weight, bias, gamma, beta, *, dilation,
                         eps=1e-5, slope=0.2, tile_l=1024):
    """DilatedConv forward: Conv1d -> BatchNorm1d (training batch stats) -> LeakyReLU(0.2).

    x_ncl:  (N, C_in, L)     PyTorch NCL layout; L maps to the 128-wide lane axis.
    weight: (C_out, C_in, K) PyTorch Conv1d weight.
    bias is accepted for API parity but not used: the BatchNorm mean subtraction
    cancels it exactly, so feeding it to the kernel would be dead work.
    """
    del bias
    n, c_in, l = x_ncl.shape
    c_out, c_in_w, k = weight.shape
    assert c_in_w == c_in
    halo = dilation * (k - 1)
    l_out = l - halo
    assert l_out > 0, "sequence too short for this kernel_size/dilation"

    # Lane-dense tiling along L.  halo_pad is the (128-aligned) extra window fetched
    # from the next tile; tile_l is forced to a multiple of halo_pad so the halo
    # block index lands exactly at element (j+1)*tile_l.
    halo_pad = max(128, _round_up(halo, 128))
    tile_l = max(128, min(_round_up(tile_l, 128), _round_up(l_out, 128)))
    tile_l = _round_up(tile_l, halo_pad)
    l_out_pad = _round_up(l_out, tile_l)
    l_in_pad = l_out_pad + halo_pad
    grid_l = l_out_pad // tile_l
    needs_mask = l_out_pad != l_out

    # Keep x in its native dtype (kernel casts per tile); pad only along L so every
    # block the grid touches is in bounds.
    # TODO(synk): the pad is still one extra HBM copy of x; an Element-indexed clamped
    # last window would remove it.
    if l_in_pad != l:
        x_p = jnp.pad(x_ncl, ((0, 0), (0, 0), (0, l_in_pad - l)))
    else:
        x_p = x_ncl

    # Flatten weight to (C_out, K*C_in) matching the in-kernel xstack row order.
    w_flat = jnp.transpose(weight, (0, 2, 1)).reshape(c_out, k * c_in).astype(jnp.float32)
    # TODO(synk): cast matmul operands to bf16 (f32 accumulation) when C_in/C_out are
    # large enough to be MXU-bound.

    halo_blocks = tile_l // halo_pad
    x_main_spec = pl.BlockSpec((1, c_in, tile_l), lambda i, j: (i, 0, j))
    x_halo_spec = pl.BlockSpec((1, c_in, halo_pad),
                               lambda i, j: (i, 0, (j + 1) * halo_blocks))
    w_spec = pl.BlockSpec((c_out, k * c_in), lambda i, j: (0, 0))
    vec_spec = pl.BlockSpec((c_out, 1), lambda i, j: (0, 0))

    # VMEM limit sized from actual tile bytes (double-buffered blocks) with headroom,
    # kept under v7x's 64 MiB physical VMEM.
    x_bytes = jnp.dtype(x_p.dtype).itemsize
    per_step_bytes = (2 * (c_in * (tile_l + halo_pad) * x_bytes + c_out * tile_l * 4)
                      + c_out * k * c_in * 4)
    vmem_limit = int(min(48 * 1024 * 1024, max(24 * 1024 * 1024, 4 * per_step_bytes)))
    cparams = pltpu.CompilerParams(
        dimension_semantics=("parallel", "parallel"),   # megacore-splittable on v7x
        vmem_limit_bytes=vmem_limit)

    # ---- pass 1: partial sums for the BatchNorm batch statistics -------------------
    stats_kernel = functools.partial(
        _stats_kernel, kernel_size=k, dilation=dilation, tile_l=tile_l,
        halo=halo, l_out=l_out, needs_mask=needs_mask)
    sums, sumsqs = pl.pallas_call(
        stats_kernel,
        out_shape=(jax.ShapeDtypeStruct((n, grid_l, c_out, 1), jnp.float32),
                   jax.ShapeDtypeStruct((n, grid_l, c_out, 1), jnp.float32)),
        grid=(n, grid_l),
        in_specs=[x_main_spec, x_halo_spec, w_spec],
        out_specs=(pl.BlockSpec((1, 1, c_out, 1), lambda i, j: (i, j, 0, 0)),
                   pl.BlockSpec((1, 1, c_out, 1), lambda i, j: (i, j, 0, 0))),
        compiler_params=cparams,
    )(x_p, x_p, w_flat)

    # ---- tiny cross-tile reduction + BN scale/shift in plain JAX -------------------
    # TODO(synk): one-pass sum/sumsq can lose precision for very large N*L with
    # |mean| >> std; switch to a shifted / two-pass accumulation if that regime matters.
    count = float(n * l_out)
    s = jnp.sum(sums, axis=(0, 1))[:, 0]
    ss = jnp.sum(sumsqs, axis=(0, 1))[:, 0]
    mean = s / count
    var = jnp.maximum(ss / count - mean * mean, 0.0)    # biased var (PyTorch training BN)
    rstd = jax.lax.rsqrt(var + eps)
    g = gamma.astype(jnp.float32)
    scale = (g * rstd).reshape(c_out, 1)
    shift = (beta.astype(jnp.float32) - mean * g * rstd).reshape(c_out, 1)

    # ---- pass 2: normalize + LeakyReLU + store --------------------------------------
    norm_kernel = functools.partial(
        _norm_kernel, kernel_size=k, dilation=dilation, tile_l=tile_l,
        halo=halo, slope=slope)
    out_pad = pl.pallas_call(
        norm_kernel,
        out_shape=jax.ShapeDtypeStruct((n, c_out, l_out_pad), x_ncl.dtype),
        grid=(n, grid_l),
        in_specs=[x_main_spec, x_halo_spec, w_spec, vec_spec, vec_spec],
        out_specs=pl.BlockSpec((1, c_out, tile_l), lambda i, j: (i, 0, j)),
        compiler_params=cparams,
    )(x_p, x_p, w_flat, scale, shift)

    if l_out_pad != l_out:
        out_pad = out_pad[:, :, :l_out]
    return out_pad


def _reference(x_ncl, weight, bias, gamma, beta, *, dilation, eps=1e-5, slope=0.2):
    """Pure-JAX reference mirroring PyTorch semantics (training-mode BatchNorm1d)."""
    n, c_in, l = x_ncl.shape
    c_out, _, k = weight.shape
    l_out = l - dilation * (k - 1)
    acc = jnp.zeros((n, c_out, l_out), jnp.float32)
    for kk in range(k):
        xs = x_ncl[:, :, kk * dilation: kk * dilation + l_out]     # (N, C_in, L_out)
        acc = acc + jnp.einsum("oc,ncl->nol", weight[:, :, kk], xs)
    acc = acc + bias[None, :, None]
    mean = jnp.mean(acc, axis=(0, 2), keepdims=True)
    var = jnp.mean((acc - mean) ** 2, axis=(0, 2), keepdims=True)
    y = (acc - mean) * jax.lax.rsqrt(var + eps) * gamma[None, :, None] + beta[None, :, None]
    return jnp.where(y >= 0, y, slope * y)


if __name__ == "__main__":
    key = jax.random.PRNGKey(0)
    k_x, k_w, k_b, k_g, k_be, k_x2 = jax.random.split(key, 6)

    # Small shapes consistent with nn.Conv1d input (N, C_in, L).
    N, C_IN, C_OUT, K, DIL = 2, 4, 8, 3, 2
    L = 16

    x = jax.random.normal(k_x, (N, C_IN, L), dtype=jnp.float32)
    weight = 0.1 * jax.random.normal(k_w, (C_OUT, C_IN, K), dtype=jnp.float32)
    bias = 0.1 * jax.random.normal(k_b, (C_OUT,), dtype=jnp.float32)
    gamma = 1.0 + 0.1 * jax.random.normal(k_g, (C_OUT,), dtype=jnp.float32)
    beta = 0.1 * jax.random.normal(k_be, (C_OUT,), dtype=jnp.float32)

    out = jax.block_until_ready(
        dilated_conv_forward(x, weight, bias, gamma, beta, dilation=DIL))
    ref = _reference(x, weight, bias, gamma, beta, dilation=DIL)
    assert out.shape == ref.shape == (N, C_OUT, L - DIL * (K - 1))
    assert jnp.allclose(out, ref, atol=1e-3, rtol=1e-3), "mismatch vs reference (cfg 1)"

    # Second, longer sequence with a small tile so multi-tile grids, the halo window
    # and the last-tile tail masking are all exercised.
    L2 = 300
    x2 = jax.random.normal(k_x2, (N, C_IN, L2), dtype=jnp.float32)
    out2 = jax.block_until_ready(
        dilated_conv_forward(x2, weight, bias, gamma, beta, dilation=DIL, tile_l=128))
    ref2 = _reference(x2, weight, bias, gamma, beta, dilation=DIL)
    assert out2.shape == ref2.shape
    assert jnp.allclose(out2, ref2, atol=1e-3, rtol=1e-3), "mismatch vs reference (cfg 2)"

    print("KERNEL_OK")
</pallas_src>

<mosaic_0001>
module attributes {stable_mosaic.version = 11 : i64} {
  func.func @_stats_kernel(%arg0: i32, %arg1: i32, %arg2: memref<1x4x128xf32, #tpu.memory_space<vmem>>, %arg3: memref<1x4x128xf32, #tpu.memory_space<vmem>>, %arg4: memref<8x12xf32, #tpu.memory_space<vmem>>, %arg5: memref<1x1x8x1xf32, #tpu.memory_space<vmem>>, %arg6: memref<1x1x8x1xf32, #tpu.memory_space<vmem>>) attributes {dimension_semantics = [#tpu.dimension_semantics<parallel>, #tpu.dimension_semantics<parallel>], iteration_bounds = array<i64: 2, 1>, scalar_prefetch = 0 : i64, scratch_operands = 0 : i64, tpu.core_type = #tpu.core_type<tc>, window_params = [{transform_indices = @transform_0, window_bounds = array<i64: 1, 4, 128>}, {transform_indices = @transform_1, window_bounds = array<i64: 1, 4, 128>}, {pipeline_mode = #tpu.pipeline_mode<synchronous>, transform_indices = @transform_2, window_bounds = array<i64: 8, 12>}, {transform_indices = @transform_3, window_bounds = array<i64: 1, 1, 8, 1>}, {transform_indices = @transform_4, window_bounds = array<i64: 1, 1, 8, 1>}]} {
    %c0 = arith.constant 0 : index
    %c0_0 = arith.constant 0 : index
    %c0_1 = arith.constant 0 : index
    %0 = vector.load %arg2[%c0, %c0_0, %c0_1] : memref<1x4x128xf32, #tpu.memory_space<vmem>>, vector<1x4x128xf32>
    %1 = vector.shape_cast %0 : vector<1x4x128xf32> to vector<4x128xf32>
    %c0_2 = arith.constant 0 : index
    %c0_3 = arith.constant 0 : index
    %c0_4 = arith.constant 0 : index
    %2 = vector.load %arg3[%c0_2, %c0_3, %c0_4] : memref<1x4x128xf32, #tpu.memory_space<vmem>>, vector<1x4x128xf32>
    %3 = vector.shape_cast %2 : vector<1x4x128xf32> to vector<4x128xf32>
    %4 = tpu.concatenate %1, %3 in 1 : vector<4x128xf32>, vector<4x128xf32> -> vector<4x256xf32>
    %5 = vector.extract_strided_slice %4 {offsets = [0, 0], sizes = [4, 128], strides = [1, 1]} : vector<4x256xf32> to vector<4x128xf32>
    %6 = vector.extract_strided_slice %4 {offsets = [0, 2], sizes = [4, 128], strides = [1, 1]} : vector<4x256xf32> to vector<4x128xf32>
    %7 = vector.extract_strided_slice %4 {offsets = [0, 4], sizes = [4, 128], strides = [1, 1]} : vector<4x256xf32> to vector<4x128xf32>
    %8 = tpu.concatenate %5, %6, %7 in 0 : vector<4x128xf32>, vector<4x128xf32>, vector<4x128xf32> -> vector<12x128xf32>
    %c0_5 = arith.constant 0 : index
    %c0_6 = arith.constant 0 : index
    %9 = vector.load %arg4[%c0_5, %c0_6] : memref<8x12xf32, #tpu.memory_space<vmem>>, vector<8x12xf32>
    %cst = arith.constant dense<0.000000e+00> : vector<8x128xf32>
    %10 = tpu.matmul %9, %8, %cst {dimension_numbers = #tpu.dot_dimension_numbers<[1], [0], [0], [1], [0, 0, 1, 1], [], []>} : vector<8x12xf32>, vector<12x128xf32>, vector<8x128xf32> -> vector<8x128xf32>
    %c0_i32 = arith.constant 0 : i32
    %11 = arith.cmpi eq, %arg1, %c0_i32 : i32
    %12 = arith.extui %11 : i1 to i32
    %c0_i32_7 = arith.constant 0 : i32
    %13 = arith.cmpi ne, %12, %c0_i32_7 : i32
    scf.if %13 {
      %17 = tpu.iota {dimensions = array<i32: 1>} : vector<8x128xi32>
      %c128_i32 = arith.constant 128 : i32
      %18 = arith.muli %arg1, %c128_i32 : i32
      %19 = vector.broadcast %18 : i32 to vector<8x128xi32>
      %20 = arith.addi %19, %17 : vector<8x128xi32>
      %c12_i32 = arith.constant 12 : i32
      %21 = vector.broadcast %c12_i32 : i32 to vector<8x128xi32>
      %22 = arith.cmpi slt, %20, %21 : vector<8x128xi32>
      %cst_10 = arith.constant 0.000000e+00 : f32
      %23 = vector.broadcast %cst_10 : f32 to vector<8x128xf32>
      %24 = arith.select %22, %10, %23 : vector<8x128xi1>, vector<8x128xf32>
      %cst_11 = arith.constant dense<0.000000e+00> : vector<8xf32>
      %25 = vector.multi_reduction <add>, %24, %cst_11 [1] : vector<8x128xf32> to vector<8xf32>
      %26 = vector.shape_cast %25 : vector<8xf32> to vector<8x1xf32>
      %c0_12 = arith.constant 0 : index
      %c0_13 = arith.constant 0 : index
      %c0_14 = arith.constant 0 : index
      %c0_15 = arith.constant 0 : index
      %27 = vector.load %arg5[%c0_12, %c0_13, %c0_14, %c0_15] : memref<1x1x8x1xf32, #tpu.memory_space<vmem>>, vector<1x1x8x1xf32>
      %28 = vector.shape_cast %27 : vector<1x1x8x1xf32> to vector<8x1xf32>
      %29 = vector.shape_cast %26 : vector<8x1xf32> to vector<1x1x8x1xf32>
      tpu.vector_store %arg5[%c0_12, %c0_13, %c0_14, %c0_15], %29 {strides = array<i32>} : memref<1x1x8x1xf32, #tpu.memory_space<vmem>>, vector<1x1x8x1xf32>,
      %30 = arith.mulf %24, %24 : vector<8x128xf32>
      %cst_16 = arith.constant dense<0.000000e+00> : vector<8xf32>
      %31 = vector.multi_reduction <add>, %30, %cst_16 [1] : vector<8x128xf32> to vector<8xf32>
      %32 = vector.shape_cast %31 : vector<8xf32> to vector<8x1xf32>
      %c0_17 = arith.constant 0 : index
      %c0_18 = arith.constant 0 : index
      %c0_19 = arith.constant 0 : index
      %c0_20 = arith.constant 0 : index
      %33 = vector.load %arg6[%c0_17, %c0_18, %c0_19, %c0_20] : memref<1x1x8x1xf32, #tpu.memory_space<vmem>>, vector<1x1x8x1xf32>
      %34 = vector.shape_cast %33 : vector<1x1x8x1xf32> to vector<8x1xf32>
      %35 = vector.shape_cast %32 : vector<8x1xf32> to vector<1x1x8x1xf32>
      tpu.vector_store %arg6[%c0_17, %c0_18, %c0_19, %c0_20], %35 {strides = array<i32>} : memref<1x1x8x1xf32, #tpu.memory_space<vmem>>, vector<1x1x8x1xf32>,
    } else {
    }
    %c0_i32_8 = arith.constant 0 : i32
    %14 = arith.cmpi ne, %arg1, %c0_i32_8 : i32
    %15 = arith.extui %14 : i1 to i32
    %c0_i32_9 = arith.constant 0 : i32
    %16 = arith.cmpi ne, %15, %c0_i32_9 : i32
    scf.if %16 {
      %cst_10 = arith.constant dense<0.000000e+00> : vector<8xf32>
      %17 = vector.multi_reduction <add>, %10, %cst_10 [1] : vector<8x128xf32> to vector<8xf32>
      %18 = vector.shape_cast %17 : vector<8xf32> to vector<8x1xf32>
      %c0_11 = arith.constant 0 : index
      %c0_12 = arith.constant 0 : index
      %c0_13 = arith.constant 0 : index
      %c0_14 = arith.constant 0 : index
      %19 = vector.load %arg5[%c0_11, %c0_12, %c0_13, %c0_14] : memref<1x1x8x1xf32, #tpu.memory_space<vmem>>, vector<1x1x8x1xf32>
      %20 = vector.shape_cast %19 : vector<1x1x8x1xf32> to vector<8x1xf32>
      %21 = vector.shape_cast %18 : vector<8x1xf32> to vector<1x1x8x1xf32>
      tpu.vector_store %arg5[%c0_11, %c0_12, %c0_13, %c0_14], %21 {strides = array<i32>} : memref<1x1x8x1xf32, #tpu.memory_space<vmem>>, vector<1x1x8x1xf32>,
      %22 = arith.mulf %10, %10 : vector<8x128xf32>
      %cst_15 = arith.constant dense<0.000000e+00> : vector<8xf32>
      %23 = vector.multi_reduction <add>, %22, %cst_15 [1] : vector<8x128xf32> to vector<8xf32>
      %24 = vector.shape_cast %23 : vector<8xf32> to vector<8x1xf32>
      %c0_16 = arith.constant 0 : index
      %c0_17 = arith.constant 0 : index
      %c0_18 = arith.constant 0 : index
      %c0_19 = arith.constant 0 : index
      %25 = vector.load %arg6[%c0_16, %c0_17, %c0_18, %c0_19] : memref<1x1x8x1xf32, #tpu.memory_space<vmem>>, vector<1x1x8x1xf32>
      %26 = vector.shape_cast %25 : vector<1x1x8x1xf32> to vector<8x1xf32>
      %27 = vector.shape_cast %24 : vector<8x1xf32> to vector<1x1x8x1xf32>
      tpu.vector_store %arg6[%c0_16, %c0_17, %c0_18, %c0_19], %27 {strides = array<i32>} : memref<1x1x8x1xf32, #tpu.memory_space<vmem>>, vector<1x1x8x1xf32>,
    } else {
    }
    return
  }
  func.func @transform_0(%arg0: i32, %arg1: i32) -> (i32, i32, i32) {
    %c0_i32 = arith.constant 0 : i32
    %c0_i32_0 = arith.constant 0 : i32
    return %arg0, %c0_i32, %arg1 : i32, i32, i32
  }
  func.func @transform_1(%arg0: i32, %arg1: i32) -> (i32, i32, i32) {
    %c1_i32 = arith.constant 1 : i32
    %0 = arith.addi %arg1, %c1_i32 : i32
    %c1_i32_0 = arith.constant 1 : i32
    %1 = arith.muli %0, %c1_i32_0 : i32
    %c0_i32 = arith.constant 0 : i32
    %c0_i32_1 = arith.constant 0 : i32
    return %arg0, %c0_i32, %1 : i32, i32, i32
  }
  func.func @transform_2(%arg0: i32, %arg1: i32) -> (i32, i32) {
    %c0_i32 = arith.constant 0 : i32
    %c0_i32_0 = arith.constant 0 : i32
    %c0_i32_1 = arith.constant 0 : i32
    return %c0_i32, %c0_i32_0 : i32, i32
  }
  func.func @transform_3(%arg0: i32, %arg1: i32) -> (i32, i32, i32, i32) {
    %c0_i32 = arith.constant 0 : i32
    %c0_i32_0 = arith.constant 0 : i32
    %c0_i32_1 = arith.constant 0 : i32
    return %arg0, %arg1, %c0_i32, %c0_i32_0 : i32, i32, i32, i32
  }
  func.func @transform_4(%arg0: i32, %arg1: i32) -> (i32, i32, i32, i32) {
    %c0_i32 = arith.constant 0 : i32
    %c0_i32_0 = arith.constant 0 : i32
    %c0_i32_1 = arith.constant 0 : i32
    return %arg0, %arg1, %c0_i32, %c0_i32_0 : i32, i32, i32, i32
  }
}

</mosaic_0001>

<bundles_post_ra>
// kernel: tpu_custom_call.1
= control target key start
LH: loop header
LB: loop body
LE: loop exit
PB: predicated region body
PF: predicated region fallthrough
CT: control target
= control target key end

     0   :  { %s966_s0 = inlined_call_operand.hbm [shape: f32[2,4,256], index: 0, kind: input, shape index: {}]   ;;  %s967_s1 = inlined_call_operand.hbm [shape: f32[2,4,256], index: 1, kind: input, shape index: {}]   ;;  %s968_s2 = inlined_call_operand.hbm [shape: f32[8,12], index: 2, kind: input, shape index: {}]   ;;  %s969_s3 = inlined_call_operand.vmem [shape: f32[2,1,8,1], index: 3, kind: output, shape index: {0}]   ;;  %s970_s4 = inlined_call_operand.vmem [shape: f32[2,1,8,1], index: 4, kind: output, shape index: {1}]  }
   0x1   :  { %973 = sst [smem:[#allocation11_spill]] %s968_s2 }
   0x2   :  { %10 = vsyncpa [#allocation3], 0 }
   0x3   :  { %12 = vsyncpa [#allocation3 + $0x1], 0 }
   0x4   :  { %13 = vsyncpa [#allocation5], 0 }
   0x5   :  { %15 = vsyncpa [#allocation5 + $0x1], 0  ;;  %s838_s15 = smov 0   ;;  %s840_s16 = smov 0  }
   0x6   :  { %s842_s17 = smov 0   ;;  %s844_s18 = smov 0  }
   0x7   :  { %s846_s19 = smov 0   ;;  %s848_s20 = smov 0  }
   0x8 LB: > { %s971_s21 = sadd.s32 4294967295, %s808_s20   ;;  %p55_p0 = scmp.ne.s32.totalorder %s792_s16, %s788_s15  ;;  %s808_s20 = sphi %s848_s20, %s21_s20   ;;  %s804_s19 = sphi %s846_s19, %s986_s19   ;;  %s800_s18 = sphi %s844_s18, %s985_s18   ;;  %s796_s17 = sphi %s842_s17, %s984_s17   ;;  %s792_s16 = sphi %s840_s16, %s983_s16   ;;  %s788_s15 = sphi %s838_s15, %s982_s15  }
   0x9   : > { %p870_p1 = scmp.eq.s32.totalorder %s971_s21, 0  ;;  %p561_p2 = scmp.ge.s32.totalorder %s808_s20, 1 }
   0xa   : > { %p173_p3 = scmp.lt.s32.totalorder %s808_s20, 3  ;;  %s976_s2 = sld [smem:[#allocation11_spill]] }
   0xb   : > { %p878_p4 = por %p870_p1, %p55_p0  ;;  %s810_s28 = smov [#allocation6]  }
   0xc   : > { %p885_p5 = pnand %p561_p2, %p173_p3  ;;  %s187_s29 = sshll.u32 %s810_s28, 4  ;;  %s188_s29 = int_to_ptr.vmem [resolvable:$true] %s187_s29 }
   0xd   : > { %s33_s30 = sadd.s32 1, %s804_s19  ;;  %s42_s5 = sadd.s32 1, %s796_s17 }
   0xe   : > { %p590_p6 = pneg %p885_p5  ;;  %p35_p8 = scmp.ge.s32.totalorder %s33_s30, 2 }
   0xf   : > { %p49_p9 = scmp.ne.s32.totalorder %s796_s17, %s792_s16  ;;  %p50_p10 = scmp.eq.s32.totalorder %s808_s20, 0 }
  0x10   : > { %s185_s26 = sshll.u32 %s976_s2, 4  ;;  %p591_p7 = pnand %p590_p6, %p870_p1  ;;  %s186_s26 = int_to_ptr.hbm [resolvable:$true] %s185_s26 }
  0x11   : > { %s988_s30 = smov (%p35_p8, %s33_s30), 0  ;;  %p900_p11 = por %p50_p10, %p49_p9 }
  0x12   : > { %593 = dma.hbm_to_vmem [thread:$0]  (!%p591_p7), %s186_s26, 128, %s188_s29, [#allocation5]  }
  0x13   : > { %978 = sst [smem:[#allocation10_spill]] %s988_s30  ;;  %p602_p12 = scmp.lt.s32.totalorder %s808_s20, 2 }
  0x14   : > { %s37_s7 = ssub.s32 %s804_s19, %s988_s30  ;;  %s198_s8 = sand.u32 1, %s796_s17  }
  0x15   : > { %p40_p13 = scmp.eq.s32.totalorder %s37_s7, 0  ;;  %s564_s9 = sshll.u32 %s198_s8, 2 }
  0x16   : > { %s580_s10 = sshll.u32 %s804_s19, 3  ;;  %s202_s24 = scalar_lea.vmem [#allocation2], %s564_s9 }
  0x17   : > { %s910_s11 = scalar_select %p40_p13, %s796_s17, %s42_s5  }
  0x18   : > { %s208_s14 = scalar_lea.hbm %s966_s0, %s580_s10  ;;  %s212_s25 = sshll.u32 %s202_s24, 4  ;;  %s213_s25 = int_to_ptr.vmem [resolvable:$true] %s212_s25 }
  0x19   : > { %s210_s15 = sshll.u32 %s208_s14, 4  ;;  %p595_p0 = pnand %p602_p12, %p900_p11  ;;  %s211_s15 = int_to_ptr.hbm [resolvable:$true] %s210_s15 }
  0x1a   : > { %s462_s29 = scalar_lea.hbm %s967_s1, %s580_s10  ;;  %s219_s7 = sand.u32 1, %s808_s20  }
  0x1b   : > { %s199_s21 = scalar_lea.sflag [#allocation3], %s198_s8  ;;  %s463_s5 = scalar_lea.hbm %s462_s29, 4 }
  0x1c   : > { %597 = dma.hbm_to_vmem [thread:$0]  (!%p595_p0), %s211_s15, 64, %s213_s25, %s199_s21  }
  0x1d   : > { %s223_s2 = scalar_lea.vmem [#allocation4], %s564_s9  ;;  %s232_s12 = sshll.u32 %s463_s5, 4  ;;  %s233_s12 = int_to_ptr.hbm [resolvable:$true] %s232_s12 }
  0x1e   : > { %s234_s30 = sshll.u32 %s223_s2, 4  ;;  %s220_s13 = scalar_lea.sflag [#allocation5], %s219_s7  ;;  %s235_s30 = int_to_ptr.vmem [resolvable:$true] %s234_s30 }
  0x1f   : > { %600 = dma.hbm_to_vmem [thread:$0]  (!%p595_p0), %s233_s12, 64, %s235_s30, %s220_s13  }
  0x20   : > { %243 = sbr.rel (%p885_p5) target bundleno = 419 (0x1a3), region = 32  ;;  %s245_s6 = sand.u32 (!%p885_p5), 1, %s792_s16  }
  0x21   : > { %s571_s14 = sshll.u32 (!%p885_p5), %s245_s6, 2  ;;  %s246_s24 = scalar_lea.sflag (!%p885_p5), [#allocation3], %s245_s6 }
  0x22   : > { %s249_s10 = scalar_lea.vmem (!%p885_p5), [#allocation2], %s571_s14 }
  0x25   : > { %775 = dma.done.wait (%p878_p4), %s246_s24, 64  }
  0x26   : > { %777 = vsyncadd (%p878_p4), %s246_s24, 4294967232  ;;  %s980_s2 = sadd.s32 4294967295, %s808_s20   ;;  %s259_s30 = scalar_lea.vmem [#allocation4], %s571_s14 }
  0x27   : > { %s255_s21 = sand.u32 1, %s980_s2  }
  0x28   : > { %s256_s8 = scalar_lea.sflag [#allocation5], %s255_s21 }
  0x29   : > { %779 = dma.done.wait (%p878_p4), %s256_s8, 64  }
  0x2a   : > { %781 = vsyncadd (%p878_p4), %s256_s8, 4294967232 }
  0x2b   : > { %783 = dma.done.wait (%p870_p1), [#allocation5], 128  }
  0x2c   : > { %785 = vsyncadd (%p870_p1), [#allocation5], 4294967168  ;;  %v319_v0 = vld [vmem:[%s249_s10] sm:$0xf]  ;;  %v320_v1 = vld [vmem:[%s259_s30] sm:$0xf]  ;;  %v371_v14 = vlaneseq }
  0x2d   : > { %s811_s27 = smov 124   ;;  %v323_v2 = vrot.slane %v319_v0, 4  ;;  %v324_v3 = vrot.slane %v320_v1, 4  ;;  %s812_s9 = smov 126   ;;  %vm329_vm0 = vcmask 1031168   ;;  %vm336_vm1 = vcmask 1014784  }
  0x2e   : > { %332 = vrot.lane.b32.xlu0 %v319_v0, %s811_s27  ;;  %vm338_vm2 = vcmask 1043456   ;;  %v340_v13 = vld [vmem:[#allocation6] sm:$0xff]  ;;  %vm341_vm3 = vcmask 97280   ;;  %v372_v15 = vand.u32 127, %v371_v14  ;;  %p305_p1 = scmp.lt.s32.totalorder %s800_s18, 1  ;;  %vm380_vm5 = vcmask 7168  }
  0x2f   : > { %v655_v4 = vpack.i.bf16 %v324_v3, %v323_v2 }
  0x30   : > { %vm376_vm4 = vcmp.lt.s32.totalorder %v372_v15, 12  ;;  %s990_s18 = smov (!%p305_p1, %s800_s18), 1 }
  0x31   : > { %656 = vrot.lane.b32.xlu1 %v655_v4, %s812_s9  ;;  %s574_s22 = sshll.u32 %s990_s18, 3 }
  0x32   : > { %s311_s25 = scalar_lea.vmem %s969_s3, %s574_s22  ;;  %s318_s29 = scalar_lea.vmem %s970_s4, %s574_s22 }
  0x36   : > { %334 = vrot.lane.b32.xlu0 %v320_v1, %s811_s27 }
  0xa0   : > { %v333_v5 = vpop.permute.xlu0 %332 }
  0xa3   : > { %v657_v6 = vpop.permute.xlu1 %656 }
  0xa4   : > { %v659_v7 = vunpack.i.h.bf16 %v657_v6  ;;  %v658_v8 = vunpack.i.l.bf16 %v657_v6 }
  0xa6   : > { %v330_v9 = vsel %vm329_vm0, %v658_v8, %v659_v7 }
  0xa7   : > { %v339_v12 = vsel %vm338_vm2, %v319_v0, %v330_v9 }
  0xa8   : > { %v335_v10 = vpop.permute.xlu0 %334 }
  0xa9   : > { %v337_v11 = vsel %vm336_vm1, %v333_v5, %v335_v10 }
  0xaa   : > { %576 = vmatpush.msk.msra.mxu0 %vm338_vm2, %v337_v11 }
  0xac   : > { %362 = vmatpush.msra.mxu0 %v339_v12 }
  0xad   : > { %577 = vmatmul.msk.f32.vlgmr.msra.gmra.mxu0 %vm341_vm3, %v340_v13 }
 0x12a   : > { %v364_v16 = vpop.f32.mrf.mxu0 }
 0x12b   : > { %v377_v17 = vsel %vm376_vm4, %v364_v16, 0.0 }
 0x12c   : > { %378 = vadd.xlane.f32.xlu1 %v377_v17  ;;  %v382_v18 = vmul.f32 %v377_v17, %v377_v17 }
 0x12e   : > { %383 = vadd.xlane.f32.xlu2 %v382_v18 }
 0x19f   : > { %v379_v19 = vpop.xlane.xlu1 %378 }
 0x1a0   : > { %381 = vst.msk [vmem:[%s311_s25] sm:$0xff] %vm380_vm5, %v379_v19 }
 0x1a1   : > { %v384_v20 = vpop.xlane.xlu2 %383 }
 0x1a2   : > { %385 = vst.msk [vmem:[%s318_s29] sm:$0xff] %vm380_vm5, %v384_v20 }
 0x1a3 PF: > { %s21_s20 = sadd.s32 1, %s808_s20   ;;  %s981_s7 = sld [smem:[#allocation10_spill]] }
 0x1a4   : > { %p18_p2 = scmp.ge.s32.totalorder %s21_s20, 4   ;;  %s982_s15 = smov %s792_s16 }
 0x1a5   : > { %s983_s16 = smov %s796_s17  ;;  %s984_s17 = smov %s910_s11 }
 0x1a6   : > { %s985_s18 = smov %s804_s19  ;;  %20 = sbr.rel (!%p18_p2) target bundleno = 8 (0x8), region = 109 }
 0x1a9   : > { %s986_s19 = smov %s981_s7 }
 0x1ab   :  { %443 = vsyncpa [#allocation3], 1 }
 0x1ac   :  { %445 = vsyncpa [#allocation3 + $0x1], 1 }
 0x1ad   :  { %446 = vsyncpa [#allocation5], 1 }
 0x1ae   :  { %448 = vsyncpa [#allocation5 + $0x1], 1 }

</bundles_post_ra>
